<compile_context>
chip_gen: v6e
topology: v6e:2x2x1
jax: 0.10.0
libtpu: 0.0.40
codegen_flags: <defaults>
</compile_context>

<pallas_src>
import functools

import jax
import jax.numpy as jnp
from jax import lax
from jax.experimental import pallas as pl
from jax.experimental.pallas import tpu as pltpu

IN_DIMS = 44
H1 = 64
H2 = 32
OUT = 2

DEFAULT_BLOCK_B = 4096  # max rows per grid step (multiple of 256)


def _cdiv(a, b):
    return (a + b - 1) // b


def _round_up(n, m):
    return ((n + m - 1) // m) * m


def _choose_tile(B, block_b):
    """Pick the batch tile (lane width of the transposed compute)."""
    if B <= 256:
        # Single full-extent block: block dims == array dims, no alignment
        # constraints, one grid step.
        return B
    block_b = max(256, _round_up(block_b, 256))
    # Lane-aligned tile (multiple of 256), capped at block_b, but small enough
    # that the grid has >= 4 steps so v7x's two TensorCores both get work.
    return min(block_b, _round_up(_cdiv(B, 4), 256))


def _mlp_kernel(x_ref, w1_ref, b1_ref, w2_ref, b2_ref, w3_ref, b3_ref, o_ref):
    # In-kernel f32 -> bf16 cast of the streamed x tile (no wrapper HBM pass).
    x_bf = x_ref[...].astype(jnp.bfloat16)                    # (tile_b, 44)

    # fc1: h1^T = W1 @ x^T via NT dot_general -> (64, tile_b); batch on MXU lanes.
    h1 = lax.dot_general(
        w1_ref[...], x_bf,
        dimension_numbers=(((1,), (1,)), ((), ())),
        preferred_element_type=jnp.float32)
    h1 = jnp.maximum(h1 + b1_ref[...], 0.0).astype(jnp.bfloat16)

    # fc2: (32, 64) @ (64, tile_b) -> (32, tile_b)
    h2 = jnp.dot(w2_ref[...], h1, preferred_element_type=jnp.float32)
    h2 = jnp.maximum(h2 + b2_ref[...], 0.0).astype(jnp.bfloat16)

    # out: (2, 32) @ (32, tile_b) -> (2, tile_b); lane-dense store, OUT on sublanes.
    o = jnp.dot(w3_ref[...], h2, preferred_element_type=jnp.float32)
    o_ref[...] = (o + b3_ref[...]).astype(o_ref.dtype)


@functools.partial(jax.jit, static_argnames=("block_b",))
def meta_classifier_forward(x, w1, b1, w2, b2, w3, b3, *, block_b=DEFAULT_BLOCK_B):
    """Fused 3-layer MLP forward.

    x: (B, 44) float32.  Weights in PyTorch convention: w_i (out, in) f32,
    biases (out, 1) f32.  Returns (B, 2) float32.
    """
    B = x.shape[0]

    # Weights are tiny (~10 KiB): cast to bf16 here; x is cast inside the kernel.
    w1b, w2b, w3b = (w.astype(jnp.bfloat16) for w in (w1, w2, w3))

    tile_b = _choose_tile(B, block_b)
    grid = (_cdiv(B, tile_b),)

    flops = 2 * B * (IN_DIMS * H1 + H1 * H2 + H2 * OUT)
    bytes_accessed = (
        B * IN_DIMS * 4                                   # f32 x stream in
        + B * OUT * 4                                     # f32 output stream out
        + (IN_DIMS * H1 + H1 * H2 + H2 * OUT) * 2         # bf16 weights (resident)
        + (H1 + H2 + OUT) * 4                             # f32 biases
    )

    const2d = lambda a: pl.BlockSpec(a.shape, lambda i: (0, 0))

    out_t = pl.pallas_call(
        _mlp_kernel,
        out_shape=jax.ShapeDtypeStruct((OUT, B), jnp.float32),
        grid=grid,
        in_specs=[
            pl.BlockSpec((tile_b, IN_DIMS), lambda i: (i, 0)),  # streamed x tile
            const2d(w1b), const2d(b1),                          # resident params
            const2d(w2b), const2d(b2),
            const2d(w3b), const2d(b3),
        ],
        out_specs=pl.BlockSpec((OUT, tile_b), lambda i: (0, i)),
        compiler_params=pltpu.CompilerParams(
            dimension_semantics=("parallel",)),
        cost_estimate=pl.CostEstimate(
            flops=flops, transcendentals=0, bytes_accessed=bytes_accessed),
    )(x, w1b, b1, w2b, b2, w3b, b3)

    # Tiny (2, B) -> (B, 2) transpose to match the PyTorch module's output layout.
    return out_t.T


def init_params(key):
    """PyTorch-default-style init: uniform +/- 1/sqrt(fan_in).
    Weights stored in PyTorch convention (out_features, in_features),
    biases as column vectors (out_features, 1)."""
    def linear(key, fan_in, fan_out):
        kw, kb = jax.random.split(key)
        bound = fan_in ** -0.5
        w = jax.random.uniform(kw, (fan_out, fan_in), jnp.float32, -bound, bound)
        b = jax.random.uniform(kb, (fan_out, 1), jnp.float32, -bound, bound)
        return w, b

    k1, k2, k3 = jax.random.split(key, 3)
    w1, b1 = linear(k1, IN_DIMS, H1)
    w2, b2 = linear(k2, H1, H2)
    w3, b3 = linear(k3, H2, OUT)
    return w1, b1, w2, b2, w3, b3


def reference_forward_f32(x, w1, b1, w2, b2, w3, b3):
    h1 = jnp.maximum(x @ w1.T + b1[:, 0], 0.0)
    h2 = jnp.maximum(h1 @ w2.T + b2[:, 0], 0.0)
    return h2 @ w3.T + b3[:, 0]


def reference_forward_bf16(x, w1, b1, w2, b2, w3, b3):
    """Mirrors the kernel's bf16-input / f32-accumulate numerics."""
    xb = x.astype(jnp.bfloat16)
    w1b, w2b, w3b = (w.astype(jnp.bfloat16) for w in (w1, w2, w3))
    h1 = jnp.maximum(
        jnp.dot(xb, w1b.T, preferred_element_type=jnp.float32) + b1[:, 0], 0.0
    ).astype(jnp.bfloat16)
    h2 = jnp.maximum(
        jnp.dot(h1, w2b.T, preferred_element_type=jnp.float32) + b2[:, 0], 0.0
    ).astype(jnp.bfloat16)
    return jnp.dot(h2, w3b.T, preferred_element_type=jnp.float32) + b3[:, 0]


if __name__ == "__main__":
    key = jax.random.PRNGKey(0)
    k_params, k_x1, k_x2 = jax.random.split(key, 3)
    params = init_params(k_params)

    # Small batch: single full-extent block.
    batch = 8
    x = jax.random.normal(k_x1, (batch, IN_DIMS), jnp.float32)
    out = jax.block_until_ready(meta_classifier_forward(x, *params))
    assert out.shape == (batch, OUT), out.shape
    assert jnp.allclose(out, reference_forward_bf16(x, *params),
                        atol=1e-2, rtol=1e-2), "mismatch vs bf16 reference"
    assert jnp.allclose(out, reference_forward_f32(x, *params),
                        atol=1e-1, rtol=1e-1), "mismatch vs f32 reference"

    # Larger, non-tile-multiple batch: exercises the grid + ragged-tail path.
    batch2 = 300
    x2 = jax.random.normal(k_x2, (batch2, IN_DIMS), jnp.float32)
    out2 = jax.block_until_ready(
        meta_classifier_forward(x2, *params, block_b=512))
    assert out2.shape == (batch2, OUT), out2.shape
    assert jnp.allclose(out2, reference_forward_bf16(x2, *params),
                        atol=1e-2, rtol=1e-2), "mismatch vs bf16 reference (grid)"
    assert jnp.allclose(out2, reference_forward_f32(x2, *params),
                        atol=1e-1, rtol=1e-1), "mismatch vs f32 reference (grid)"

    print("KERNEL_OK")
</pallas_src>

<mosaic_0001>
module attributes {stable_mosaic.version = 11 : i64} {
  func.func @_mlp_kernel(%arg0: i32, %arg1: memref<8x44xf32, #tpu.memory_space<vmem>>, %arg2: memref<64x44xbf16, #tpu.memory_space<vmem>>, %arg3: memref<64x1xf32, #tpu.memory_space<vmem>>, %arg4: memref<32x64xbf16, #tpu.memory_space<vmem>>, %arg5: memref<32x1xf32, #tpu.memory_space<vmem>>, %arg6: memref<2x32xbf16, #tpu.memory_space<vmem>>, %arg7: memref<2x1xf32, #tpu.memory_space<vmem>>, %arg8: memref<2x8xf32, #tpu.memory_space<vmem>>) attributes {dimension_semantics = [#tpu.dimension_semantics<parallel>], iteration_bounds = array<i64: 1>, scalar_prefetch = 0 : i64, scratch_operands = 0 : i64, tpu.core_type = #tpu.core_type<tc>, window_params = [{transform_indices = @transform_0, window_bounds = array<i64: 8, 44>}, {pipeline_mode = #tpu.pipeline_mode<synchronous>, transform_indices = @transform_1, window_bounds = array<i64: 64, 44>}, {pipeline_mode = #tpu.pipeline_mode<synchronous>, transform_indices = @transform_2, window_bounds = array<i64: 64, 1>}, {pipeline_mode = #tpu.pipeline_mode<synchronous>, transform_indices = @transform_3, window_bounds = array<i64: 32, 64>}, {pipeline_mode = #tpu.pipeline_mode<synchronous>, transform_indices = @transform_4, window_bounds = array<i64: 32, 1>}, {pipeline_mode = #tpu.pipeline_mode<synchronous>, transform_indices = @transform_5, window_bounds = array<i64: 2, 32>}, {pipeline_mode = #tpu.pipeline_mode<synchronous>, transform_indices = @transform_6, window_bounds = array<i64: 2, 1>}, {transform_indices = @transform_7, window_bounds = array<i64: 2, 8>}]} {
    %c0 = arith.constant 0 : index
    %c0_0 = arith.constant 0 : index
    %0 = vector.load %arg1[%c0, %c0_0] : memref<8x44xf32, #tpu.memory_space<vmem>>, vector<8x44xf32>
    %1 = arith.truncf %0 : vector<8x44xf32> to vector<8x44xbf16>
    %c0_1 = arith.constant 0 : index
    %c0_2 = arith.constant 0 : index
    %2 = vector.load %arg2[%c0_1, %c0_2] : memref<64x44xbf16, #tpu.memory_space<vmem>>, vector<64x44xbf16>
    %cst = arith.constant dense<0.000000e+00> : vector<64x8xf32>
    %3 = tpu.matmul %2, %1, %cst {dimension_numbers = #tpu.dot_dimension_numbers<[1], [1], [0], [0], [0, 0, 1, 0], [], []>} : vector<64x44xbf16>, vector<8x44xbf16>, vector<64x8xf32> -> vector<64x8xf32>
    %c0_3 = arith.constant 0 : index
    %c0_4 = arith.constant 0 : index
    %4 = vector.load %arg3[%c0_3, %c0_4] : memref<64x1xf32, #tpu.memory_space<vmem>>, vector<64x1xf32>
    %5 = vector.broadcast %4 : vector<64x1xf32> to vector<64x8xf32>
    %6 = arith.addf %3, %5 : vector<64x8xf32>
    %cst_5 = arith.constant 0.000000e+00 : f32
    %7 = vector.broadcast %cst_5 : f32 to vector<64x8xf32>
    %8 = arith.maximumf %6, %7 : vector<64x8xf32>
    %9 = arith.truncf %8 : vector<64x8xf32> to vector<64x8xbf16>
    %c0_6 = arith.constant 0 : index
    %c0_7 = arith.constant 0 : index
    %10 = vector.load %arg4[%c0_6, %c0_7] : memref<32x64xbf16, #tpu.memory_space<vmem>>, vector<32x64xbf16>
    %cst_8 = arith.constant dense<0.000000e+00> : vector<32x8xf32>
    %11 = tpu.matmul %10, %9, %cst_8 {dimension_numbers = #tpu.dot_dimension_numbers<[1], [0], [0], [1], [0, 0, 1, 1], [], []>} : vector<32x64xbf16>, vector<64x8xbf16>, vector<32x8xf32> -> vector<32x8xf32>
    %c0_9 = arith.constant 0 : index
    %c0_10 = arith.constant 0 : index
    %12 = vector.load %arg5[%c0_9, %c0_10] : memref<32x1xf32, #tpu.memory_space<vmem>>, vector<32x1xf32>
    %13 = vector.broadcast %12 : vector<32x1xf32> to vector<32x8xf32>
    %14 = arith.addf %11, %13 : vector<32x8xf32>
    %cst_11 = arith.constant 0.000000e+00 : f32
    %15 = vector.broadcast %cst_11 : f32 to vector<32x8xf32>
    %16 = arith.maximumf %14, %15 : vector<32x8xf32>
    %17 = arith.truncf %16 : vector<32x8xf32> to vector<32x8xbf16>
    %c0_12 = arith.constant 0 : index
    %c0_13 = arith.constant 0 : index
    %18 = vector.load %arg6[%c0_12, %c0_13] : memref<2x32xbf16, #tpu.memory_space<vmem>>, vector<2x32xbf16>
    %cst_14 = arith.constant dense<0.000000e+00> : vector<2x8xf32>
    %19 = tpu.matmul %18, %17, %cst_14 {dimension_numbers = #tpu.dot_dimension_numbers<[1], [0], [0], [1], [0, 0, 1, 1], [], []>} : vector<2x32xbf16>, vector<32x8xbf16>, vector<2x8xf32> -> vector<2x8xf32>
    %c0_15 = arith.constant 0 : index
    %c0_16 = arith.constant 0 : index
    %20 = vector.load %arg7[%c0_15, %c0_16] : memref<2x1xf32, #tpu.memory_space<vmem>>, vector<2x1xf32>
    %21 = vector.broadcast %20 : vector<2x1xf32> to vector<2x8xf32>
    %22 = arith.addf %19, %21 : vector<2x8xf32>
    %c0_17 = arith.constant 0 : index
    %c0_18 = arith.constant 0 : index
    %23 = vector.load %arg8[%c0_17, %c0_18] : memref<2x8xf32, #tpu.memory_space<vmem>>, vector<2x8xf32>
    tpu.vector_store %arg8[%c0_17, %c0_18], %22 {strides = array<i32>} : memref<2x8xf32, #tpu.memory_space<vmem>>, vector<2x8xf32>,
    return
  }
  func.func @transform_0(%arg0: i32) -> (i32, i32) {
    %c0_i32 = arith.constant 0 : i32
    %c0_i32_0 = arith.constant 0 : i32
    return %arg0, %c0_i32 : i32, i32
  }
  func.func @transform_1(%arg0: i32) -> (i32, i32) {
    %c0_i32 = arith.constant 0 : i32
    %c0_i32_0 = arith.constant 0 : i32
    %c0_i32_1 = arith.constant 0 : i32
    return %c0_i32, %c0_i32_0 : i32, i32
  }
  func.func @transform_2(%arg0: i32) -> (i32, i32) {
    %c0_i32 = arith.constant 0 : i32
    %c0_i32_0 = arith.constant 0 : i32
    %c0_i32_1 = arith.constant 0 : i32
    return %c0_i32, %c0_i32_0 : i32, i32
  }
  func.func @transform_3(%arg0: i32) -> (i32, i32) {
    %c0_i32 = arith.constant 0 : i32
    %c0_i32_0 = arith.constant 0 : i32
    %c0_i32_1 = arith.constant 0 : i32
    return %c0_i32, %c0_i32_0 : i32, i32
  }
  func.func @transform_4(%arg0: i32) -> (i32, i32) {
    %c0_i32 = arith.constant 0 : i32
    %c0_i32_0 = arith.constant 0 : i32
    %c0_i32_1 = arith.constant 0 : i32
    return %c0_i32, %c0_i32_0 : i32, i32
  }
  func.func @transform_5(%arg0: i32) -> (i32, i32) {
    %c0_i32 = arith.constant 0 : i32
    %c0_i32_0 = arith.constant 0 : i32
    %c0_i32_1 = arith.constant 0 : i32
    return %c0_i32, %c0_i32_0 : i32, i32
  }
  func.func @transform_6(%arg0: i32) -> (i32, i32) {
    %c0_i32 = arith.constant 0 : i32
    %c0_i32_0 = arith.constant 0 : i32
    %c0_i32_1 = arith.constant 0 : i32
    return %c0_i32, %c0_i32_0 : i32, i32
  }
  func.func @transform_7(%arg0: i32) -> (i32, i32) {
    %c0_i32 = arith.constant 0 : i32
    %c0_i32_0 = arith.constant 0 : i32
    return %c0_i32, %arg0 : i32, i32
  }
}

</mosaic_0001>

<bundles_post_ra>
// kernel: meta_classifier_forward.1
= control target key start
LH: loop header
LB: loop body
LE: loop exit
PB: predicated region body
PF: predicated region fallthrough
CT: control target
= control target key end

     0   :  { %vm106_vm0 = vcmask 359424   ;;  %v458_v3 = vmov 0   ;;  %s576_s0 = inlined_call_operand.vmem [shape: f32[8,44], index: 0, kind: input, shape index: {}]   ;;  %s577_s1 = inlined_call_operand.vmem [shape: bf16[64,44], index: 1, kind: input, shape index: {}]   ;;  %s578_s2 = inlined_call_operand.vmem [shape: f32[64,1], index: 2, kind: input, shape index: {}]   ;;  %s579_s3 = inlined_call_operand.vmem [shape: bf16[32,64], index: 3, kind: input, shape index: {}]   ;;  %s580_s4 = inlined_call_operand.vmem [shape: f32[32,1], index: 4, kind: input, shape index: {}]   ;;  %s581_s5 = inlined_call_operand.vmem [shape: bf16[2,32], index: 5, kind: input, shape index: {}]   ;;  %s582_s6 = inlined_call_operand.vmem [shape: f32[2,1], index: 6, kind: input, shape index: {}]   ;;  %s583_s7 = inlined_call_operand.hbm [shape: f32[2,8], index: 7, kind: output, shape index: {}]  }
   0x1   :  { %v28_v0 = vld [vmem:[%s576_s0] sm:$0xff]  ;;  %428 = vset.pattern.permute.xlu0 %v458_v3  ;;  %429 = vset.pattern.permute.xlu1 %v458_v3  ;;  %v44_v5 = vld [vmem:[%s578_s2 + $0x30] sm:$0xff]  ;;  %v45_v7 = vld [vmem:[%s578_s2 + $0x38] sm:$0xff] }
   0x2   :  { %v29_v1 = vpack.c.bf16 %v28_v0, %v28_v0  ;;  %v430_v2 = vld [vmem:[%s577_s1] sm:$0xff]   ;;  %78 = vperm.xlu0 %428, %v44_v5   ;;  %v431_v8 = vld [vmem:[%s577_s1 + $0x8] sm:$0xff]   ;;  %v432_v10 = vld [vmem:[%s577_s1 + $0x10] sm:$0xff]  }
   0x3   :  { %395 = vmatprep.mubr.msk.bf16.mxu0 %vm106_vm0, %v430_v2  ;;  %v42_v6 = vld [vmem:[%s578_s2 + $0x20] sm:$0xff]  ;;  %v43_v9 = vld [vmem:[%s578_s2 + $0x28] sm:$0xff]  ;;  %v40_v11 = vld [vmem:[%s578_s2 + $0x10] sm:$0xff] }
   0x4   :  { %423 = vmatprep.subr.msk.bf16.mxu0 %vm106_vm0, %v29_v1  ;;  %v120_v4 = vsel %vm106_vm0, %v29_v1, 0  ;;  %68 = vperm.xlu1 %429, %v42_v6  }
   0x5   :  { %394 = vmatpush3.bf16.xpose.msra.mxu0 %v120_v4 }
   0x6   :  { %83 = vperm.xlu0 %428, %v45_v7  }
   0x8   :  { %73 = vperm.xlu1 %429, %v43_v9  }
   0x9   :  { %12 = vsyncpa [#allocation3], 0  ;;  %v41_v12 = vld [vmem:[%s578_s2 + $0x18] sm:$0xff]  ;;  %v38_v13 = vld [vmem:[%s578_s2] sm:$0xff]  ;;  %vm237_vm1 = vcmask 523264   ;;  %v459_v59 = vmov 0.0  }
   0xa   :  { %58 = vperm.xlu0 %428, %v40_v11   ;;  %v433_v14 = vld [vmem:[%s577_s1 + $0x18] sm:$0xff]   ;;  %v39_v15 = vld [vmem:[%s578_s2 + $0x8] sm:$0xff]  ;;  %v205_v16 = vld [vmem:[%s580_s4 + $0x10] sm:$0xff]  ;;  %415 = vmatprep.subr.bf16.mxu0 %v459_v59  ;;  %vm460_vm2 = vmmov 0   ;;  %vm306_vm3 = vcmask 261120   ;;  %s461_s13 = smov [#allocation2]  }
   0xb   :  { %v206_v17 = vld [vmem:[%s580_s4 + $0x18] sm:$0xff]  ;;  %v203_v18 = vld [vmem:[%s580_s4] sm:$0xff]  ;;  %v204_v19 = vld [vmem:[%s580_s4 + $0x8] sm:$0xff]  ;;  %s358_s14 = sshll.u32 %s461_s13, 4  ;;  %vm350_vm4 = vcmask 58368   ;;  %s359_s14 = int_to_ptr.vmem [resolvable:$true] %s358_s14 }
   0xc   :  { %396 = vmatmul.mubr.msk.bf16.vlgmr.msra.gmra.mxu0 %vm106_vm0, %v431_v8  ;;  %63 = vperm.xlu1 %429, %v41_v12   ;;  %v300_v20 = vld [vmem:[%s582_s6] sm:$0x3]  ;;  %v435_v58 = vld [vmem:[%s579_s3 + $0x8] sm:$0xff]   ;;  %s436_s15 = scalar_lea.vmem %s359_s14, 32  ;;  %p441_p1 = scmp.lt.s32.totalorder %s359_s14, %s359_s14 }
   0xd   :  { %399 = vmatprep.mubr.msk.bf16.mxu0 %vm106_vm0, %v432_v10  ;;  %v434_v21 = vld [vmem:[%s579_s3] sm:$0xff]   ;;  %p437_p0 = scmp.ne.s32.totalorder %s359_s14, %s436_s15  ;;  %p442_p2 = scmp.lt.s32.totalorder %s436_s15, %s436_s15 }
   0xe   :  { %48 = vperm.xlu0 %428, %v38_v13   ;;  %411 = vmatprep.mubr.msk.bf16.mxu1 %vm237_vm1, %v434_v21 }
   0xf   :  { %p443_p3 = por %p442_p2, %p441_p1 }
  0x10   :  { %53 = vperm.xlu1 %429, %v39_v15  }
  0x11   :  { %p444_p4 = pnand %p443_p3, %p437_p0 }
  0x12   :  { %219 = vperm.xlu0 %428, %v205_v16  }
  0x14   :  { %400 = vmatmul.mubr.msk.bf16.gmra.mxu0 %vm106_vm0, %v433_v14  ;;  %224 = vperm.xlu1 %429, %v206_v17   ;;  %v299_v14 = vld [vmem:[%s581_s5] sm:$0x1] }
  0x15   :  { %419 = vmatprep.mubr.msk.bf16.mxu0 %vm460_vm2, %v459_v59 }
  0x16   :  { %209 = vperm.xlu0 %428, %v203_v18  }
  0x18   :  { %214 = vperm.xlu1 %429, %v204_v19  }
  0x1a   :  { %303 = vperm.xlu0 %428, %v300_v20  }
  0x7d   :  { %v79_v24 = vpop.permute.xlu0 %78 }
  0x7f   :  { %v69_v22 = vpop.permute.xlu1 %68 }
  0x81   :  { %v84_v29 = vpop.permute.xlu0 %83 }
  0x83   :  { %v74_v27 = vpop.permute.xlu1 %73 }
  0x85   :  { %v59_v37 = vpop.permute.xlu0 %58 }
  0x87   :  { %v64_v33 = vpop.permute.xlu1 %63 }
  0x89   :  { %v49_v51 = vpop.permute.xlu0 %48 }
  0x8b   :  { %v54_v47 = vpop.permute.xlu1 %53 }
  0x8d   :  { %v220_v60 = vpop.permute.xlu0 %219 }
  0x8f   :  { %v225_v61 = vpop.permute.xlu1 %224 }
  0x91   :  { %v210_v2 = vpop.permute.xlu0 %209 }
  0x93   :  { %v215_v4 = vpop.permute.xlu1 %214 }
  0x95   :  { %v304_v15 = vpop.permute.xlu0 %303 }
  0xcc   :  { %v397_v23 = vpop.f32.mrf.mxu0 }
  0xcd   :  { %v165_v43 = vadd.f32 %v397_v23, %v59_v37 }
  0xce   :  { %v156_v25 = vpop.f32.mrf.mxu0 }
  0xcf   :  { %v189_v52 = vmax.f32 %v165_v43, 0.0  ;;  %v157_v53 = vadd.f32 %v156_v25, %v49_v51 }
  0xd0   :  { %v398_v26 = vpop.f32.mrf.mxu0 }
  0xd1   :  { %v168_v39 = vadd.f32 %v398_v26, %v64_v33  ;;  %v187_v56 = vmax.f32 %v157_v53, 0.0 }
  0xd2   :  { %v159_v28 = vpop.f32.mrf.mxu0 }
  0xd3   :  { %v190_v48 = vmax.f32 %v168_v39, 0.0  ;;  %v160_v49 = vadd.f32 %v159_v28, %v54_v47 }
  0xd4   :  { %v401_v30 = vpop.f32.mrf.mxu0 }
  0xd5   :  { %v181_v32 = vadd.f32 %v401_v30, %v79_v24  ;;  %v196_v54 = vpack.c.bf16 %v190_v48, %v189_v52  ;;  %v188_v55 = vmax.f32 %v160_v49, 0.0 }
  0xd6   :  { %v172_v31 = vpop.f32.mrf.mxu0 }
  0xd7   :  { %v173_v35 = vadd.f32 %v172_v31, %v69_v22  ;;  %v193_v40 = vmax.f32 %v181_v32, 0.0  ;;  %v195_v57 = vpack.c.bf16 %v188_v55, %v187_v56 }
  0xd8   :  { %v402_v34 = vpop.f32.mrf.mxu0 }
  0xd9   :  { %v184_v36 = vadd.f32 %v402_v34, %v84_v29  ;;  %v191_v44 = vmax.f32 %v173_v35, 0.0 }
  0xda   :  { %v175_v38 = vpop.f32.mrf.mxu0 }
  0xdb   :  { %v194_v41 = vmax.f32 %v184_v36, 0.0  ;;  %v176_v42 = vadd.f32 %v175_v38, %v74_v27 }
  0xdd   :  { %v192_v45 = vmax.f32 %v176_v42, 0.0  ;;  %v198_v46 = vpack.c.bf16 %v194_v41, %v193_v40 }
  0xdf   :  { %v197_v50 = vpack.c.bf16 %v192_v45, %v191_v44  ;;  %403 = vmatprep.subr.bf16.mxu1 %v198_v46 }
  0xe0   :  { %404 = vmatpush3.bf16.msra.mxu1 %v198_v46 }
  0xe1   :  { %405 = vmatprep.subr.bf16.mxu1 %v197_v50 }
  0xe4   :  { %406 = vmatpush3.bf16.msra.mxu1 %v197_v50 }
  0xe5   :  { %407 = vmatprep.subr.bf16.mxu1 %v196_v54 }
  0xe8   :  { %408 = vmatpush3.bf16.msra.mxu1 %v196_v54 }
  0xe9   :  { %409 = vmatprep.subr.bf16.mxu1 %v195_v57 }
  0xec   :  { %410 = vmatpush3.bf16.msra.mxu1 %v195_v57 }
  0xef   :  { %412 = vmatmul.mubr.msk.bf16.vlgmr.msra.gmra.mxu1 %vm237_vm1, %v435_v58 }
 0x1af   :  { %v413_v62 = vpop.f32.mrf.mxu1 }
 0x1b0   :  { %v287_v0 = vadd.f32 %v413_v62, %v220_v60 }
 0x1b1   :  { %v278_v63 = vpop.f32.mrf.mxu1 }
 0x1b2   :  { %v295_v6 = vmax.f32 %v287_v0, 0.0  ;;  %v279_v7 = vadd.f32 %v278_v63, %v210_v2 }
 0x1b3   :  { %v414_v1 = vpop.f32.mrf.mxu1 }
 0x1b4   :  { %v290_v3 = vadd.f32 %v414_v1, %v225_v61  ;;  %v293_v12 = vmax.f32 %v279_v7, 0.0 }
 0x1b5   :  { %v281_v5 = vpop.f32.mrf.mxu1 }
 0x1b6   :  { %v296_v8 = vmax.f32 %v290_v3, 0.0  ;;  %v282_v9 = vadd.f32 %v281_v5, %v215_v4 }
 0x1b8   :  { %v298_v10 = vpack.c.bf16 %v296_v8, %v295_v6  ;;  %v294_v11 = vmax.f32 %v282_v9, 0.0 }
 0x1ba   :  { %416 = vmatpush3.bf16.msra.mxu0 %v298_v10  ;;  %v297_v13 = vpack.c.bf16 %v294_v11, %v293_v12 }
 0x1bb   :  { %417 = vmatprep.subr.bf16.mxu0 %v459_v59 }
 0x1be   :  { %418 = vmatpush3.bf16.msra.mxu0 %v297_v13 }
 0x1c1   :  { %420 = vmatmul.mubr.msk.bf16.vlgmr.msra.gmra.mxu0 %vm306_vm3, %v299_v14 }
 0x281   :  { %v344_v16 = vpop.f32.mrf.mxu0 }
 0x282   :  { %v345_v17 = vadd.f32 %v344_v16, %v304_v15 }
 0x283   :  { %v421_v18 = vpop.f32.mrf.mxu0 }
 0x284   :  { %351 = vst.msk [vmem:[#allocation2] sm:$0x3] %vm350_vm4, %v345_v17 }
 0x285   :  { %v347_v19 = vpop.f32.mrf.mxu0 }
 0x286   :  { %447 = shalt.err (!%p444_p4)
}
 0x287   :  { %361 = dma.vmem_to_hbm [thread:$0]  %s359_s14, 32, %s583_s7, [#allocation3]   ;;  %v422_v20 = vpop.f32.mrf.mxu0 }
 0x288   :  { %456 = dma.done.wait [#allocation3], 32  }
 0x289   :  { %457 = vsyncadd [#allocation3], 4294967264 }
 0x28a   :  { %365 = vsyncpa [#allocation3], 1 }

</bundles_post_ra>
